<compile_context>
chip_gen: v7x
topology: tpu7x:2x2x1
jax: 0.10.0
libtpu: 0.0.40
codegen_flags: <defaults>
</compile_context>

<pallas_src>
import functools

import jax
import jax.numpy as jnp
from jax.experimental import pallas as pl
from jax.experimental.pallas import tpu as pltpu


def mlp_kernel(x_ref, w1_ref, b1_ref, w2_ref, b2_ref, o_ref, *, use_bf16):
    x = x_ref[...]
    w1 = w1_ref[...]
    w2 = w2_ref[...]
    if use_bf16:
        x = x.astype(jnp.bfloat16)
        w1 = w1.astype(jnp.bfloat16)
    # hidden = relu(x @ W1 + b1), f32 accumulation on the MXU
    h = jnp.dot(x, w1, preferred_element_type=jnp.float32)
    h = jnp.maximum(h + b1_ref[...], 0.0)
    if use_bf16:
        h = h.astype(jnp.bfloat16)
        w2 = w2.astype(jnp.bfloat16)
    # out = hidden @ W2 + b2  (W2/b2 already zero-padded to a lane-dense width)
    y = jnp.dot(h, w2, preferred_element_type=jnp.float32)
    o_ref[...] = (y + b2_ref[...]).astype(o_ref.dtype)


def qnet_forward(x, w1, b1, w2, b2, *, use_bf16=False, block_b=256):
    B, K = x.shape
    H = w1.shape[1]
    A = w2.shape[1]

    # Lane-dense output slab: pad the output feature dim to a multiple of 128
    # (actionSize=8 would otherwise force masked partial stores).
    n_pad = max(128, ((A + 127) // 128) * 128)
    if n_pad != A:
        w2p = jnp.zeros((H, n_pad), w2.dtype).at[:, :A].set(w2)
        b2p = jnp.zeros((1, n_pad), b2.dtype).at[:, :A].set(b2)
    else:
        w2p, b2p = w2, b2
    # NOTE: K (=lookBack) could also be zero-padded to 128 for better MXU depth
    # fill; only worth it once the call is compute-bound, so left as-is.

    kernel = functools.partial(mlp_kernel, use_bf16=use_bf16)

    if B <= block_b:
        # Single-shot: whole problem resident in VMEM, no grid, no pipelining.
        out = pl.pallas_call(
            kernel,
            out_shape=jax.ShapeDtypeStruct((B, n_pad), jnp.float32),
            in_specs=[pl.BlockSpec(memory_space=pltpu.MemorySpace.VMEM)] * 5,
            out_specs=pl.BlockSpec(memory_space=pltpu.MemorySpace.VMEM),
        )(x, w1, b1, w2p, b2p)
    else:
        # Batched: tile the batch over a parallel grid axis (2 TCs on v7x).
        nblk = pl.cdiv(B, block_b)
        Bp = nblk * block_b
        xp = x if Bp == B else jnp.zeros((Bp, K), x.dtype).at[:B].set(x)
        out = pl.pallas_call(
            kernel,
            out_shape=jax.ShapeDtypeStruct((Bp, n_pad), jnp.float32),
            grid=(nblk,),
            in_specs=[
                pl.BlockSpec((block_b, K), lambda i: (i, 0)),
                pl.BlockSpec((K, H), lambda i: (0, 0)),
                pl.BlockSpec((1, H), lambda i: (0, 0)),
                pl.BlockSpec((H, n_pad), lambda i: (0, 0)),
                pl.BlockSpec((1, n_pad), lambda i: (0, 0)),
            ],
            out_specs=pl.BlockSpec((block_b, n_pad), lambda i: (i, 0)),
            compiler_params=pltpu.CompilerParams(
                dimension_semantics=("parallel",)),
        )(xp, w1, b1, w2p, b2p)
        out = out[:B]

    return out[:, :A]


def init_params(key, lookBack, actionSize, hidden=256):
    # Deterministic init mimicking nn.Linear's uniform(-1/sqrt(fan_in), +1/sqrt(fan_in)).
    k1, k2, k3, k4 = jax.random.split(key, 4)
    bound1 = 1.0 / jnp.sqrt(lookBack)
    bound2 = 1.0 / jnp.sqrt(hidden)
    w1 = jax.random.uniform(k1, (lookBack, hidden), jnp.float32, -bound1, bound1)
    b1 = jax.random.uniform(k2, (1, hidden), jnp.float32, -bound1, bound1)
    w2 = jax.random.uniform(k3, (hidden, actionSize), jnp.float32, -bound2, bound2)
    b2 = jax.random.uniform(k4, (1, actionSize), jnp.float32, -bound2, bound2)
    return w1, b1, w2, b2


if __name__ == "__main__":
    lookBack = 32      # input feature size (state lookback window)
    actionSize = 8     # number of actions

    key = jax.random.PRNGKey(0)
    kx, kb, kp = jax.random.split(key, 3)
    w1, b1, w2, b2 = init_params(kp, lookBack, actionSize)

    # --- small single-shot path (no grid, everything in VMEM) ---
    x_small = jax.random.normal(kx, (8, lookBack), jnp.float32)
    out_small = jax.block_until_ready(qnet_forward(x_small, w1, b1, w2, b2))
    ref_small = jnp.maximum(x_small @ w1 + b1, 0.0) @ w2 + b2
    assert out_small.shape == (8, actionSize)
    assert jnp.allclose(out_small, ref_small, atol=1e-5, rtol=1e-5)

    # --- batched path (parallel batch grid; amortizes launch overhead) ---
    x_big = jax.random.normal(kb, (512, lookBack), jnp.float32)
    out_big = jax.block_until_ready(qnet_forward(x_big, w1, b1, w2, b2))
    ref_big = jnp.maximum(x_big @ w1 + b1, 0.0) @ w2 + b2
    assert out_big.shape == (512, actionSize)
    assert jnp.allclose(out_big, ref_big, atol=1e-4, rtol=1e-4)

    # --- bf16 MXU-operand path (f32 accumulate), looser tolerance ---
    out_bf16 = jax.block_until_ready(
        qnet_forward(x_big, w1, b1, w2, b2, use_bf16=True))
    assert jnp.allclose(out_bf16, ref_big, atol=5e-2, rtol=5e-2)

    print("KERNEL_OK")
</pallas_src>

<mosaic_0001>
module attributes {stable_mosaic.version = 11 : i64} {
  func.func @mlp_kernel(%arg0: memref<8x32xf32, #tpu.memory_space<vmem>>, %arg1: memref<32x256xf32, #tpu.memory_space<vmem>>, %arg2: memref<1x256xf32, #tpu.memory_space<vmem>>, %arg3: memref<256x128xf32, #tpu.memory_space<vmem>>, %arg4: memref<1x128xf32, #tpu.memory_space<vmem>>, %arg5: memref<8x128xf32, #tpu.memory_space<vmem>>) attributes {dimension_semantics = [], scalar_prefetch = 0 : i64, scratch_operands = 0 : i64, tpu.core_type = #tpu.core_type<tc>} {
    %c0 = arith.constant 0 : index
    %c0_0 = arith.constant 0 : index
    %0 = vector.load %arg0[%c0, %c0_0] : memref<8x32xf32, #tpu.memory_space<vmem>>, vector<8x32xf32>
    %c0_1 = arith.constant 0 : index
    %c0_2 = arith.constant 0 : index
    %1 = vector.load %arg1[%c0_1, %c0_2] : memref<32x256xf32, #tpu.memory_space<vmem>>, vector<32x256xf32>
    %c0_3 = arith.constant 0 : index
    %c0_4 = arith.constant 0 : index
    %2 = vector.load %arg3[%c0_3, %c0_4] : memref<256x128xf32, #tpu.memory_space<vmem>>, vector<256x128xf32>
    %cst = arith.constant dense<0.000000e+00> : vector<8x256xf32>
    %3 = tpu.matmul %0, %1, %cst {dimension_numbers = #tpu.dot_dimension_numbers<[1], [0], [0], [1], [0, 0, 1, 1], [], []>} : vector<8x32xf32>, vector<32x256xf32>, vector<8x256xf32> -> vector<8x256xf32>
    %c0_5 = arith.constant 0 : index
    %c0_6 = arith.constant 0 : index
    %4 = vector.load %arg2[%c0_5, %c0_6] : memref<1x256xf32, #tpu.memory_space<vmem>>, vector<1x256xf32>
    %5 = vector.broadcast %4 : vector<1x256xf32> to vector<8x256xf32>
    %6 = arith.addf %3, %5 : vector<8x256xf32>
    %cst_7 = arith.constant 0.000000e+00 : f32
    %7 = vector.broadcast %cst_7 : f32 to vector<8x256xf32>
    %8 = arith.maximumf %6, %7 : vector<8x256xf32>
    %cst_8 = arith.constant dense<0.000000e+00> : vector<8x128xf32>
    %9 = tpu.matmul %8, %2, %cst_8 {dimension_numbers = #tpu.dot_dimension_numbers<[1], [0], [0], [1], [0, 0, 1, 1], [], []>} : vector<8x256xf32>, vector<256x128xf32>, vector<8x128xf32> -> vector<8x128xf32>
    %c0_9 = arith.constant 0 : index
    %c0_10 = arith.constant 0 : index
    %10 = vector.load %arg4[%c0_9, %c0_10] : memref<1x128xf32, #tpu.memory_space<vmem>>, vector<1x128xf32>
    %11 = vector.broadcast %10 : vector<1x128xf32> to vector<8x128xf32>
    %12 = arith.addf %9, %11 : vector<8x128xf32>
    %c0_11 = arith.constant 0 : index
    %c0_12 = arith.constant 0 : index
    %13 = vector.load %arg5[%c0_11, %c0_12] : memref<8x128xf32, #tpu.memory_space<vmem>>, vector<8x128xf32>
    tpu.vector_store %arg5[%c0_11, %c0_12], %12 {strides = array<i32>} : memref<8x128xf32, #tpu.memory_space<vmem>>, vector<8x128xf32>,
    return
  }
}

</mosaic_0001>

<bundles_post_ra>
// kernel: tpu_custom_call.1
= control target key start
LH: loop header
LB: loop body
LE: loop exit
PB: predicated region body
PF: predicated region fallthrough
CT: control target
= control target key end

     0   :  { %10 = vsyncpa [#allocation3], 0  ;;  %s557_s0 = inlined_call_operand.hbm [shape: f32[8,32], index: 0, kind: input, shape index: {}]   ;;  %s558_s1 = inlined_call_operand.hbm [shape: f32[32,256], index: 1, kind: input, shape index: {}]   ;;  %s559_s2 = inlined_call_operand.vmem [shape: f32[1,256], index: 2, kind: input, shape index: {}]   ;;  %s560_s3 = inlined_call_operand.hbm [shape: f32[256,128], index: 3, kind: input, shape index: {}]   ;;  %s561_s4 = inlined_call_operand.vmem [shape: f32[1,128], index: 4, kind: input, shape index: {}]   ;;  %s562_s5 = inlined_call_operand.hbm [shape: f32[8,128], index: 5, kind: output, shape index: {}]  }
   0x1   :  { %11 = vsyncpa [#allocation6], 0 }
   0x2   :  { %12 = vsyncpa [#allocation4], 0  ;;  %s464_s18 = smov [#allocation5]   ;;  %s370_s22 = scalar_lea.hbm %s558_s1, 1024 }
   0x3   :  { %s28_s19 = sshll.u32 %s464_s18, 4  ;;  %p371_p0 = scmp.ne.s32.totalorder %s558_s1, %s370_s22  ;;  %s29_s19 = int_to_ptr.vmem [resolvable:$true] %s28_s19 }
   0x4   :  { %p374_p1 = scmp.lt.u32.totalorder %s370_s22, %s558_s1 }
   0x6   :  { %p376_p2 = pnand %p374_p1, %p371_p0 }
   0x8   :  { %379 = shalt.err (!%p376_p2)
}
   0x9   :  { %s380_s27 = scalar_lea.vmem %s29_s19, 1024  ;;  %p385_p4 = scmp.lt.s32.totalorder %s29_s19, %s29_s19 }
   0xa   :  { %p381_p3 = scmp.ne.s32.totalorder %s29_s19, %s380_s27  ;;  %p386_p5 = scmp.lt.s32.totalorder %s380_s27, %s380_s27 }
   0xc   :  { %p387_p6 = por %p386_p5, %p385_p4 }
   0xe   :  { %p388_p7 = pnand %p387_p6, %p381_p3 }
  0x10   :  { %391 = shalt.err (!%p388_p7)
}
  0x11   :  { %s465_s28 = smov 256   ;;  %s466_s29 = smov 16  }
  0x12   :  { %34 = dma.hbm_to_vmem [thread:$0]  %s558_s1, 1024, %s29_s19, [#allocation6], %s465_s28, %s465_s28, %s466_s29  }
  0x13   :  { %s467_s7 = smov [#allocation2]   ;;  %s468_s9 = smov [#allocation7]  }
  0x14   :  { %s19_s8 = sshll.u32 %s467_s7, 4  ;;  %s42_s10 = sshll.u32 %s468_s9, 4  ;;  %s20_s8 = int_to_ptr.vmem [resolvable:$true] %s19_s8  ;;  %s43_s10 = int_to_ptr.vmem [resolvable:$true] %s42_s10 }
  0x15   :  { %s392_s13 = scalar_lea.hbm %s557_s0, 128 }
  0x16   :  { %p393_p8 = scmp.ne.s32.totalorder %s557_s0, %s392_s13  ;;  %p396_p9 = scmp.lt.u32.totalorder %s392_s13, %s557_s0 }
  0x18   :  { %p398_p10 = pnand %p396_p9, %p393_p8 }
  0x1a   :  { %401 = shalt.err (!%p398_p10)
}
  0x1b   :  { %s402_s1 = scalar_lea.vmem %s20_s8, 128  ;;  %p407_p12 = scmp.lt.s32.totalorder %s20_s8, %s20_s8 }
  0x1c   :  { %p403_p11 = scmp.ne.s32.totalorder %s20_s8, %s402_s1  ;;  %p408_p13 = scmp.lt.s32.totalorder %s402_s1, %s402_s1 }
  0x1e   :  { %p409_p0 = por %p408_p13, %p407_p12 }
  0x20   :  { %p410_p1 = pnand %p409_p0, %p403_p11 }
  0x22   :  { %413 = shalt.err (!%p410_p1)
}
  0x23   :  { %22 = dma.hbm_to_vmem [thread:$0]  %s557_s0, 128, %s20_s8, [#allocation3]  }
  0x24   :  { %s414_s22 = scalar_lea.hbm %s560_s3, 4096 }
  0x25   :  { %p415_p2 = scmp.ne.s32.totalorder %s560_s3, %s414_s22  ;;  %p418_p3 = scmp.lt.u32.totalorder %s414_s22, %s560_s3 }
  0x27   :  { %p420_p4 = pnand %p418_p3, %p415_p2 }
  0x29   :  { %423 = shalt.err (!%p420_p4)
}
  0x2a   :  { %s424_s27 = scalar_lea.vmem %s43_s10, 4096  ;;  %p429_p6 = scmp.lt.s32.totalorder %s43_s10, %s43_s10 }
  0x2b   :  { %p425_p5 = scmp.ne.s32.totalorder %s43_s10, %s424_s27  ;;  %p430_p7 = scmp.lt.s32.totalorder %s424_s27, %s424_s27 }
  0x2d   :  { %p431_p8 = por %p430_p7, %p429_p6 }
  0x2f   :  { %p432_p9 = pnand %p431_p8, %p425_p5 }
  0x31   :  { %435 = shalt.err (!%p432_p9)
}
  0x32   :  { %s469_s0 = smov 128   ;;  %s470_s28 = smov 8  }
  0x33   :  { %48 = dma.hbm_to_vmem [thread:$0]  %s560_s3, 4096, %s43_s10, [#allocation6], %s469_s0, %s469_s0, %s470_s28  }
  0x34   :  { %458 = dma.done.wait [#allocation3], 128  }
  0x35   :  { %459 = vsyncadd [#allocation3], 4294967168 }
  0x36   :  { %460 = dma.done.wait [#allocation6], 5120  }
  0x37   :  { %461 = vsyncadd [#allocation6], 4294962176  ;;  %v471_v0 = vmov 0.0   ;;  %v62_v1 = vld [vmem:[#allocation5 + $0x8] sm:$0xff]  ;;  %v64_v2 = vld [vmem:[#allocation5 + $0x18] sm:$0xff]  ;;  %vm113_vm0 = vcmask 261120   ;;  %v103_v62 = vlaneseq }
  0x38   :  { %181 = vmatprep.mubr.f32.mxu0 %v471_v0  ;;  %v61_v3 = vld [vmem:[#allocation5] sm:$0xff]  ;;  %v321_v4 = vpack.c.bf16 %v64_v2, %v62_v1  ;;  %v63_v5 = vld [vmem:[#allocation5 + $0x10] sm:$0xff]  ;;  %v66_v6 = vld [vmem:[#allocation5 + $0x28] sm:$0xff]  ;;  %s472_s9 = smov [#allocation8]  }
  0x39   :  { %v68_v7 = vld [vmem:[#allocation5 + $0x38] sm:$0xff]  ;;  %v323_v8 = vpack.c.bf16 %v63_v5, %v61_v3  ;;  %v65_v10 = vld [vmem:[#allocation5 + $0x20] sm:$0xff]  ;;  %v67_v11 = vld [vmem:[#allocation5 + $0x30] sm:$0xff]  ;;  %v104_v63 = vshrl.u32 %v103_v62, 7  ;;  %s274_s10 = sshll.u32 %s472_s9, 4  ;;  %s275_s10 = int_to_ptr.vmem [resolvable:$true] %s274_s10 }
  0x3a   :  { %v325_v9 = vpack.c.bf16 %v68_v7, %v66_v6  ;;  %322 = vmatprep.subr.bf16.mxu0 %v321_v4  ;;  %v85_v12 = vld [vmem:[#allocation7 + $0x80] sm:$0xff]  ;;  %v86_v13 = vld [vmem:[#allocation7 + $0x88] sm:$0xff]  ;;  %v327_v15 = vpack.c.bf16 %v67_v11, %v65_v10  ;;  %v87_v18 = vld [vmem:[#allocation7 + $0x90] sm:$0xff]  ;;  %p441_p11 = scmp.lt.s32.totalorder %s275_s10, %s275_s10 }
  0x3b   :  { %v69_v14 = vld [vmem:[#allocation7] sm:$0xff]  ;;  %324 = vmatpush1.bf16.msra.mxu0 %v323_v8  ;;  %v329_v16 = vpack.c.bf16 %v86_v13, %v85_v12  ;;  %v70_v17 = vld [vmem:[#allocation7 + $0x8] sm:$0xff]  ;;  %v88_v19 = vld [vmem:[#allocation7 + $0x98] sm:$0xff]  ;;  %v105_v0 = vsub.s32 0, %v104_v63  ;;  %v109_v2 = vsub.s32 1, %v104_v63 }
  0x3c   :  { %326 = vmatprep.subr.bf16.mxu0 %v325_v9  ;;  %v331_v20 = vpack.c.bf16 %v70_v17, %v69_v14  ;;  %v333_v21 = vpack.c.bf16 %v88_v19, %v87_v18  ;;  %v71_v22 = vld [vmem:[#allocation7 + $0x10] sm:$0xff]  ;;  %v72_v23 = vld [vmem:[#allocation7 + $0x18] sm:$0xff]  ;;  %v89_v24 = vld [vmem:[#allocation7 + $0xa0] sm:$0xff] }
  0x3d   :  { %330 = vmatprep.subr.bf16.mxu1 %v329_v16  ;;  %v90_v25 = vld [vmem:[#allocation7 + $0xa8] sm:$0xff]  ;;  %v335_v26 = vpack.c.bf16 %v72_v23, %v71_v22  ;;  %v60_v27 = vld [vmem:[#allocation2] sm:$0xff]  ;;  %v73_v29 = vld [vmem:[#allocation7 + $0x20] sm:$0xff] }
  0x3e   :  { %332 = vmatpush3.bf16.msra.mxu1 %v331_v20  ;;  %v337_v28 = vpack.c.bf16 %v90_v25, %v89_v24  ;;  %v74_v30 = vld [vmem:[#allocation7 + $0x28] sm:$0xff]  ;;  %v91_v31 = vld [vmem:[#allocation7 + $0xb0] sm:$0xff]  ;;  %v92_v32 = vld [vmem:[#allocation7 + $0xb8] sm:$0xff] }
  0x3f   :  { %328 = vmatpush1.bf16.msra.mxu0 %v327_v15  ;;  %334 = vmatprep.subr.bf16.mxu1 %v333_v21  ;;  %v339_v33 = vpack.c.bf16 %v74_v30, %v73_v29  ;;  %v341_v34 = vpack.c.bf16 %v92_v32, %v91_v31  ;;  %v75_v35 = vld [vmem:[#allocation7 + $0x30] sm:$0xff]  ;;  %v76_v36 = vld [vmem:[#allocation7 + $0x38] sm:$0xff]  ;;  %v93_v37 = vld [vmem:[#allocation7 + $0xc0] sm:$0xff] }
  0x40   :  { %v94_v38 = vld [vmem:[#allocation7 + $0xc8] sm:$0xff]  ;;  %v343_v39 = vpack.c.bf16 %v76_v36, %v75_v35  ;;  %v77_v41 = vld [vmem:[#allocation7 + $0x40] sm:$0xff]  ;;  %v95_v43 = vld [vmem:[#allocation7 + $0xd0] sm:$0xff] }
  0x41   :  { %v345_v40 = vpack.c.bf16 %v94_v38, %v93_v37  ;;  %v78_v42 = vld [vmem:[#allocation7 + $0x48] sm:$0xff]  ;;  %v96_v44 = vld [vmem:[#allocation7 + $0xd8] sm:$0xff]  ;;  %v79_v47 = vld [vmem:[#allocation7 + $0x50] sm:$0xff] }
  0x42   :  { %284 = vmatmul.mubr.msk.f32.vlgmr.msra.gmra.mrb[0].mxu0 %vm113_vm0, %v60_v27  ;;  %336 = vmatpush3.bf16.msra.mxu1 %v335_v26  ;;  %v347_v45 = vpack.c.bf16 %v78_v42, %v77_v41  ;;  %v349_v46 = vpack.c.bf16 %v96_v44, %v95_v43  ;;  %v80_v48 = vld [vmem:[#allocation7 + $0x58] sm:$0xff]  ;;  %v97_v49 = vld [vmem:[#allocation7 + $0xe0] sm:$0xff]  ;;  %v98_v50 = vld [vmem:[#allocation7 + $0xe8] sm:$0xff] }
  0x43   :  { %338 = vmatprep.subr.bf16.mxu1 %v337_v28  ;;  %v351_v51 = vpack.c.bf16 %v80_v48, %v79_v47  ;;  %v353_v52 = vpack.c.bf16 %v98_v50, %v97_v49  ;;  %v81_v53 = vld [vmem:[#allocation7 + $0x60] sm:$0xff]  ;;  %v82_v54 = vld [vmem:[#allocation7 + $0x68] sm:$0xff]  ;;  %v99_v56 = vld [vmem:[#allocation7 + $0xf0] sm:$0xff] }
  0x44   :  { %v355_v55 = vpack.c.bf16 %v82_v54, %v81_v53  ;;  %v100_v57 = vld [vmem:[#allocation7 + $0xf8] sm:$0xff]  ;;  %v83_v59 = vld [vmem:[#allocation7 + $0x70] sm:$0xff] }
  0x45   :  { %v357_v58 = vpack.c.bf16 %v100_v57, %v99_v56  ;;  %v84_v60 = vld [vmem:[#allocation7 + $0x78] sm:$0xff] }
  0x46   :  { %340 = vmatpush3.bf16.msra.mxu1 %v339_v33  ;;  %v359_v61 = vpack.c.bf16 %v84_v60, %v83_v59  ;;  %v101_v1 = vld [vmem:[%s559_s2] sm:$0x3]  ;;  %s436_s2 = scalar_lea.vmem %s275_s10, 128 }
  0x47   :  { %342 = vmatprep.subr.bf16.mxu1 %v341_v34  ;;  %v106_v3 = vrot.slane %v101_v1, %v105_v0  ;;  %v110_v4 = vrot.slane %v101_v1, %v109_v2  ;;  %v285_v12 = vld [vmem:[%s561_s4] ss:$0 sm:$0xff]  ;;  %p437_p10 = scmp.ne.s32.totalorder %s275_s10, %s436_s2  ;;  %p442_p12 = scmp.lt.s32.totalorder %s436_s2, %s436_s2 }
  0x49   :  { %p443_p13 = por %p442_p12, %p441_p11 }
  0x4a   :  { %344 = vmatpush3.bf16.msra.mxu1 %v343_v39 }
  0x4b   :  { %346 = vmatprep.subr.bf16.mxu1 %v345_v40  ;;  %p444_p0 = pnand %p443_p13, %p437_p10 }
  0x4e   :  { %348 = vmatpush3.bf16.msra.mxu1 %v347_v45 }
  0x4f   :  { %350 = vmatprep.subr.bf16.mxu1 %v349_v46 }
  0x52   :  { %352 = vmatpush3.bf16.msra.mxu1 %v351_v51 }
  0x53   :  { %354 = vmatprep.subr.bf16.mxu1 %v353_v52 }
  0x56   :  { %356 = vmatpush3.bf16.msra.mxu1 %v355_v55 }
  0x57   :  { %358 = vmatprep.subr.bf16.mxu1 %v357_v58 }
  0x5a   :  { %360 = vmatpush3.bf16.msra.mxu1 %v359_v61 }
 0x115   :  { %v183_v5 = vpop.f32.mrb[0].mxu0 }
 0x116   :  { %v184_v6 = vadd.f32 %v183_v5, %v106_v3  ;;  %v185_v7 = vpop.f32.mrb[1].mxu0 }
 0x117   :  { %v186_v8 = vadd.f32 %v185_v7, %v110_v4 }
 0x118   :  { %v188_v10 = vmax.f32 %v184_v6, 0.0 }
 0x119   :  { %v189_v9 = vmax.f32 %v186_v8, 0.0 }
 0x11b   :  { %261 = vmatprep.mubr.f32.mxu1 %v189_v9 }
 0x11c   :  { %262 = vmatmul.mubr.f32.vlgmr.msra.gmra.mrb[0].mxu1 %v188_v10 }
 0x1ef   :  { %v318_v11 = vpop.f32.mrb[0].mxu1 }
 0x1f0   :  { %v319_v13 = vpop.f32.mrb[1].mxu1 }
 0x1f1   :  { %v320_v14 = vadd.f32 %v319_v13, %v318_v11 }
 0x1f3   :  { %v264_v15 = vadd.f32 %v320_v14, %v285_v12 }
 0x1f5   :  { %267 = vst [vmem:[#allocation8] sm:$0xff] %v264_v15 }
 0x1f6   :  { %447 = shalt.err (!%p444_p0)
}
 0x1f7   :  { %s448_s13 = scalar_lea.hbm %s562_s5, 128 }
 0x1f8   :  { %p449_p1 = scmp.ne.s32.totalorder %s562_s5, %s448_s13  ;;  %p452_p2 = scmp.lt.u32.totalorder %s448_s13, %s562_s5 }
 0x1fa   :  { %p454_p3 = pnand %p452_p2, %p449_p1 }
 0x1fc   :  { %457 = shalt.err (!%p454_p3)
}
 0x1fd   :  { %277 = dma.vmem_to_hbm [thread:$0]  %s275_s10, 128, %s562_s5, [#allocation4]  }
 0x1fe   :  { %462 = dma.done.wait [#allocation4], 128  }
 0x1ff   :  { %463 = vsyncadd [#allocation4], 4294967168 }
 0x200   :  { %281 = vsyncpa [#allocation3], 1 }
 0x201   :  { %282 = vsyncpa [#allocation6], 1 }
 0x202   :  { %283 = vsyncpa [#allocation4], 1 }

</bundles_post_ra>
